<compile_context>
chip_gen: v7x
topology: tpu7x:2x2x1
jax: 0.10.0
libtpu: 0.0.40
codegen_flags: <defaults>
</compile_context>

<pallas_src>
import functools

import jax
import jax.numpy as jnp
from jax import lax
from jax.experimental import pallas as pl
from jax.experimental.pallas import tpu as pltpu


def _sum_all(x):
    # Full reduction to a (1, 1) tile (sequential axis reductions lower cleanly).
    return jnp.sum(jnp.sum(x, axis=1, keepdims=True), axis=0, keepdims=True)


def _infonce_kernel(q_ref, kn_hbm, t_ref, out_ref,
                    kn_vmem, col_se_ref, diag_acc, sim_acc, lse_row_acc,
                    *, eps, n_total, tm):
    r = pl.program_id(0)
    last = pl.num_programs(0) - 1

    @pl.when(r == 0)
    def _init():
        # One-time DMA of the pre-normalized bf16 k into VMEM.  It stays
        # resident (single copy, no double buffering) for every row tile.
        pltpu.sync_copy(kn_hbm, kn_vmem)
        col_se_ref[...] = jnp.zeros_like(col_se_ref)
        diag_acc[...] = jnp.zeros_like(diag_acc)
        sim_acc[...] = jnp.zeros_like(sim_acc)
        lse_row_acc[...] = jnp.zeros_like(lse_row_acc)

    scale = jnp.exp(t_ref[0, 0])                 # exp(temperature), the logit scale

    q = q_ref[...].astype(jnp.float32)           # (tm, D) row tile of inputs_q
    # exp(temperature) folded into the q normalization scale (EUP rsqrt, no divides);
    # the sim tile comes out of the MXU already scaled.
    qn = q * (scale * lax.rsqrt(jnp.sum(q * q, axis=1, keepdims=True) + 1e-12))

    kn = kn_vmem[...]                            # (N, D) bf16, resident normalized k
    # TODO(synk): check the Mosaic dump for a per-tile relayout of kn caused by
    # contracting dim (1,1); if present, store kn pre-transposed as (D, N).
    sim = lax.dot_general(
        qn.astype(jnp.bfloat16), kn,
        dimension_numbers=(((1,), (1,)), ((), ())),
        preferred_element_type=jnp.float32)      # (tm, N) scaled logits

    # Diagonal entries of the global sim matrix for this tile's rows: sliced from
    # the resident kn (tm*D work, no N^2 iota/mask, no extra input stream).
    row0 = pl.multiple_of(r * tm, tm)
    kn_rows = kn_vmem[pl.ds(row0, tm), :].astype(jnp.float32)     # (tm, D)
    diag = jnp.sum(qn * kn_rows, axis=1, keepdims=True)           # (tm, 1)

    # Analytic shared max: cosine sims <= 1 so sim <= scale.  One exp pass per
    # tile feeds BOTH the exact row LSE and the column sum-exp accumulator, with
    # no max pass and no rescale factors.
    # TODO(synk): if the learned logit scale is allowed to grow unbounded
    # (CLIP clamps exp(t) at 100), exp(sim - scale) can underflow whole
    # rows/columns; a fully safe variant needs true per-row / online column maxes.
    e = jnp.exp(sim - scale)                                      # (tm, N)
    lse_row = scale + jnp.log(jnp.sum(e, axis=1, keepdims=True))  # (tm, 1) exact row LSE
    col_se_ref[...] += jnp.sum(e, axis=0, keepdims=True)          # (1, N) column partials

    diag_acc[...] += _sum_all(diag)
    sim_acc[...] += _sum_all(sim)
    lse_row_acc[...] += _sum_all(lse_row)

    @pl.when(r == last)
    def _finalize():
        n_f = jnp.float32(n_total)
        lse_col = scale + jnp.log(col_se_ref[...])                # (1, N)
        s_lse_col = _sum_all(lse_col)                             # (1, 1)
        # Label-smoothed CE over rows and columns, averaged (analytic form):
        # loss = (1/n) * [ -(1-eps)*S_diag - (eps/n)*S_sim + 0.5*(S_lse_row + S_lse_col) ]
        out_ref[...] = ((-(1.0 - eps) * diag_acc[...]
                         - (eps / n_f) * sim_acc[...]
                         + 0.5 * (lse_row_acc[...] + s_lse_col)) / n_f)


def infonce_loss(inputs_q, inputs_k, temperature, label_smoothing=0.3,
                 block_rows=256, vmem_limit_bytes=None):
    """JAX/Pallas equivalent of InfoNCELoss.forward."""
    assert inputs_q.shape == inputs_k.shape and inputs_q.ndim == 2
    N, D = inputs_q.shape

    if N <= block_rows:
        tm = N
    else:
        # TODO(synk): pad/mask a ragged final row tile; for CLIP-scale N add a
        # column-tile axis (pipeline k as (tn, D) blocks, flash-style row LSE)
        # and split row tiles across v7x's two TensorCores.
        assert N % block_rows == 0, "N must be a multiple of block_rows"
        tm = block_rows
    num_tiles = N // tm

    # Normalize k ONCE here and hand the kernel a bf16 copy: removes the per-tile
    # rsqrt/mul/cast pass over the full (N, D) array and halves its VMEM footprint.
    k32 = inputs_k.astype(jnp.float32)
    kn = (k32 * lax.rsqrt(jnp.sum(k32 * k32, axis=1, keepdims=True) + 1e-12)
          ).astype(jnp.bfloat16)

    t = jnp.asarray(temperature, jnp.float32).reshape(1, 1)

    if vmem_limit_bytes is None:
        # Safe on v7x (64 MiB VMEM/TC); on v5e/v6e (128 MiB) raise this together
        # with block_rows (512-1024) to fill VMEM with bigger row tiles.
        vmem_limit_bytes = 56 * 1024 * 1024

    kernel = functools.partial(_infonce_kernel,
                               eps=float(label_smoothing), n_total=N, tm=tm)

    out = pl.pallas_call(
        kernel,
        out_shape=jax.ShapeDtypeStruct((1, 1), jnp.float32),
        grid=(num_tiles,),
        in_specs=[
            pl.BlockSpec((tm, D), lambda r: (r, 0)),            # q row tile (pipelined)
            pl.BlockSpec(memory_space=pl.ANY),                  # normalized bf16 k (one-time DMA)
            pl.BlockSpec(memory_space=pltpu.MemorySpace.SMEM),  # temperature scalar
        ],
        out_specs=pl.BlockSpec((1, 1), lambda r: (0, 0)),
        scratch_shapes=[
            pltpu.VMEM((N, D), jnp.bfloat16),   # resident normalized k (single copy)
            pltpu.VMEM((1, N), jnp.float32),    # column sum-exp accumulator
            pltpu.VMEM((1, 1), jnp.float32),    # sum of diagonal
            pltpu.VMEM((1, 1), jnp.float32),    # sum of all sim entries
            pltpu.VMEM((1, 1), jnp.float32),    # sum of row LSEs
        ],
        compiler_params=pltpu.CompilerParams(
            dimension_semantics=("arbitrary",),  # carries the column accumulator
            vmem_limit_bytes=vmem_limit_bytes,
        ),
    )(inputs_q.astype(jnp.float32), kn, t)
    return out[0, 0]


def _reference_loss(q, k, temperature, eps):
    """Pure-JAX reference matching the PyTorch module."""
    n = q.shape[0]
    qn = q / jnp.linalg.norm(q, axis=1, keepdims=True)
    kn = k / jnp.linalg.norm(k, axis=1, keepdims=True)
    sim = (qn @ kn.T) * jnp.exp(temperature)
    logp_r = jax.nn.log_softmax(sim, axis=1)
    logp_c = jax.nn.log_softmax(sim, axis=0)
    loss_i = jnp.mean(-(1.0 - eps) * jnp.diag(logp_r)
                      - (eps / n) * jnp.sum(logp_r, axis=1))
    loss_t = jnp.mean(-(1.0 - eps) * jnp.diag(logp_c)
                      - (eps / n) * jnp.sum(logp_c, axis=0))
    return 0.5 * (loss_i + loss_t)


if __name__ == "__main__":
    # Deterministic parameter init (matches nn.Parameter(ones([]) * log(1/0.07))).
    temperature = jnp.log(jnp.float32(1.0 / 0.07))

    key = jax.random.PRNGKey(0)
    kq, kk = jax.random.split(key)
    N, D = 8, 32
    inputs_q = jax.random.normal(kq, (N, D), dtype=jnp.float32)
    inputs_k = jax.random.normal(kk, (N, D), dtype=jnp.float32)

    loss = infonce_loss(inputs_q, inputs_k, temperature, label_smoothing=0.3)
    jax.block_until_ready(loss)

    ref = _reference_loss(inputs_q, inputs_k, temperature, 0.3)
    assert bool(jnp.isfinite(loss)), float(loss)
    # Error budget: bf16 rounding of qn/kn gives <=~2^-8 relative logit error
    # (~0.05 absolute at scale~14.3); the resulting loss shift stays well below 0.1.
    assert abs(float(loss) - float(ref)) < 0.1, (float(loss), float(ref))
    print("KERNEL_OK")
</pallas_src>

<mosaic_0001>
module attributes {stable_mosaic.version = 11 : i64} {
  func.func @_infonce_kernel(%arg0: i32, %arg1: memref<8x32xf32, #tpu.memory_space<vmem>>, %arg2: memref<8x32xbf16, #tpu.memory_space<any>>, %arg3: memref<1x1xf32, #tpu.memory_space<smem>>, %arg4: memref<1x1xf32, #tpu.memory_space<vmem>>, %arg5: memref<8x32xbf16, #tpu.memory_space<vmem>>, %arg6: memref<1x8xf32, #tpu.memory_space<vmem>>, %arg7: memref<1x1xf32, #tpu.memory_space<vmem>>, %arg8: memref<1x1xf32, #tpu.memory_space<vmem>>, %arg9: memref<1x1xf32, #tpu.memory_space<vmem>>) attributes {dimension_semantics = [#tpu.dimension_semantics<arbitrary>], iteration_bounds = array<i64: 1>, scalar_prefetch = 0 : i64, scratch_operands = 5 : i64, tpu.core_type = #tpu.core_type<tc>, window_params = [{transform_indices = @transform_0, window_bounds = array<i64: 8, 32>}, {}, {transform_indices = @transform_2, window_bounds = array<i64: 1, 1>}, {pipeline_mode = #tpu.pipeline_mode<synchronous>, transform_indices = @transform_3, window_bounds = array<i64: 1, 1>}]} {
    %c0_i32 = arith.constant 0 : i32
    %0 = arith.cmpi eq, %arg0, %c0_i32 : i32
    %1 = arith.extui %0 : i1 to i32
    %c0_i32_0 = arith.constant 0 : i32
    %2 = arith.cmpi ne, %1, %c0_i32_0 : i32
    scf.if %2 {
      "tpu.region"() ({
        %72 = tpu.sem_alloc : memref<!tpu.dma_semaphore, #tpu.memory_space<semaphore_mem>>
        tpu.enqueue_dma source(%arg2 : memref<8x32xbf16, #tpu.memory_space<any>>) target(%arg5 : memref<8x32xbf16, #tpu.memory_space<vmem>>) target_semaphore(%72 : memref<!tpu.dma_semaphore, #tpu.memory_space<semaphore_mem>>)
        tpu.wait_dma2 semaphore(%72 : memref<!tpu.dma_semaphore, #tpu.memory_space<semaphore_mem>>) src(%arg2 : memref<8x32xbf16, #tpu.memory_space<any>>) dst(%arg5 : memref<8x32xbf16, #tpu.memory_space<vmem>>)
        tpu.yield
      }) : () -> ()
      %cst_36 = arith.constant 0.000000e+00 : f32
      %64 = vector.broadcast %cst_36 : f32 to vector<1x8xf32>
      %c0_37 = arith.constant 0 : index
      %c0_38 = arith.constant 0 : index
      %65 = vector.load %arg6[%c0_37, %c0_38] : memref<1x8xf32, #tpu.memory_space<vmem>>, vector<1x8xf32>
      tpu.vector_store %arg6[%c0_37, %c0_38], %64 {strides = array<i32>} : memref<1x8xf32, #tpu.memory_space<vmem>>, vector<1x8xf32>,
      %cst_39 = arith.constant 0.000000e+00 : f32
      %66 = vector.broadcast %cst_39 : f32 to vector<1x1xf32>
      %c0_40 = arith.constant 0 : index
      %c0_41 = arith.constant 0 : index
      %67 = vector.load %arg7[%c0_40, %c0_41] : memref<1x1xf32, #tpu.memory_space<vmem>>, vector<1x1xf32>
      tpu.vector_store %arg7[%c0_40, %c0_41], %66 {strides = array<i32>} : memref<1x1xf32, #tpu.memory_space<vmem>>, vector<1x1xf32>,
      %cst_42 = arith.constant 0.000000e+00 : f32
      %68 = vector.broadcast %cst_42 : f32 to vector<1x1xf32>
      %c0_43 = arith.constant 0 : index
      %c0_44 = arith.constant 0 : index
      %69 = vector.load %arg8[%c0_43, %c0_44] : memref<1x1xf32, #tpu.memory_space<vmem>>, vector<1x1xf32>
      tpu.vector_store %arg8[%c0_43, %c0_44], %68 {strides = array<i32>} : memref<1x1xf32, #tpu.memory_space<vmem>>, vector<1x1xf32>,
      %cst_45 = arith.constant 0.000000e+00 : f32
      %70 = vector.broadcast %cst_45 : f32 to vector<1x1xf32>
      %c0_46 = arith.constant 0 : index
      %c0_47 = arith.constant 0 : index
      %71 = vector.load %arg9[%c0_46, %c0_47] : memref<1x1xf32, #tpu.memory_space<vmem>>, vector<1x1xf32>
      tpu.vector_store %arg9[%c0_46, %c0_47], %70 {strides = array<i32>} : memref<1x1xf32, #tpu.memory_space<vmem>>, vector<1x1xf32>,
    } else {
    }
    %c0 = arith.constant 0 : index
    %c0_1 = arith.constant 0 : index
    %3 = memref.load %arg3[%c0, %c0_1] : memref<1x1xf32, #tpu.memory_space<smem>>
    %4 = math.exp %3 : f32
    %c0_2 = arith.constant 0 : index
    %c0_3 = arith.constant 0 : index
    %5 = vector.load %arg1[%c0_2, %c0_3] : memref<8x32xf32, #tpu.memory_space<vmem>>, vector<8x32xf32>
    %6 = arith.mulf %5, %5 : vector<8x32xf32>
    %cst = arith.constant dense<0.000000e+00> : vector<8xf32>
    %7 = vector.multi_reduction <add>, %6, %cst [1] : vector<8x32xf32> to vector<8xf32>
    %8 = vector.shape_cast %7 : vector<8xf32> to vector<8x1xf32>
    %cst_4 = arith.constant 9.99999996E-13 : f32
    %9 = vector.broadcast %cst_4 : f32 to vector<8x1xf32>
    %10 = arith.addf %8, %9 : vector<8x1xf32>
    %11 = math.rsqrt %10 : vector<8x1xf32>
    %12 = vector.broadcast %4 : f32 to vector<8x1xf32>
    %13 = arith.mulf %12, %11 : vector<8x1xf32>
    %14 = vector.broadcast %13 : vector<8x1xf32> to vector<8x32xf32>
    %15 = arith.mulf %5, %14 : vector<8x32xf32>
    %c0_5 = arith.constant 0 : index
    %c0_6 = arith.constant 0 : index
    %16 = vector.load %arg5[%c0_5, %c0_6] : memref<8x32xbf16, #tpu.memory_space<vmem>>, vector<8x32xbf16>
    %17 = arith.truncf %15 : vector<8x32xf32> to vector<8x32xbf16>
    %cst_7 = arith.constant dense<0.000000e+00> : vector<8x8xf32>
    %18 = tpu.matmul %17, %16, %cst_7 {dimension_numbers = #tpu.dot_dimension_numbers<[1], [1], [0], [0], [0, 0, 1, 0], [], []>} : vector<8x32xbf16>, vector<8x32xbf16>, vector<8x8xf32> -> vector<8x8xf32>
    %c8_i32 = arith.constant 8 : i32
    %19 = arith.muli %arg0, %c8_i32 : i32
    %20 = tpu.assume_multiple %19, 8 : i32
    %21 = arith.index_cast %20 : i32 to index
    %c0_8 = arith.constant 0 : index
    %22 = vector.load %arg5[%21, %c0_8] : memref<8x32xbf16, #tpu.memory_space<vmem>>, vector<8x32xbf16>
    %23 = arith.extf %22 : vector<8x32xbf16> to vector<8x32xf32>
    %24 = arith.mulf %15, %23 : vector<8x32xf32>
    %cst_9 = arith.constant dense<0.000000e+00> : vector<8xf32>
    %25 = vector.multi_reduction <add>, %24, %cst_9 [1] : vector<8x32xf32> to vector<8xf32>
    %26 = vector.shape_cast %25 : vector<8xf32> to vector<8x1xf32>
    %27 = vector.broadcast %4 : f32 to vector<8x8xf32>
    %28 = arith.subf %18, %27 : vector<8x8xf32>
    %29 = math.exp %28 : vector<8x8xf32>
    %cst_10 = arith.constant dense<0.000000e+00> : vector<8xf32>
    %30 = vector.multi_reduction <add>, %29, %cst_10 [1] : vector<8x8xf32> to vector<8xf32>
    %31 = vector.shape_cast %30 : vector<8xf32> to vector<8x1xf32>
    %32 = math.log %31 : vector<8x1xf32>
    %33 = vector.broadcast %4 : f32 to vector<8x1xf32>
    %34 = arith.addf %33, %32 : vector<8x1xf32>
    %c0_11 = arith.constant 0 : index
    %c0_12 = arith.constant 0 : index
    %35 = vector.load %arg6[%c0_11, %c0_12] : memref<1x8xf32, #tpu.memory_space<vmem>>, vector<1x8xf32>
    %cst_13 = arith.constant dense<0.000000e+00> : vector<8xf32>
    %36 = vector.multi_reduction <add>, %29, %cst_13 [0] : vector<8x8xf32> to vector<8xf32>
    %37 = vector.shape_cast %36 : vector<8xf32> to vector<1x8xf32>
    %38 = arith.addf %35, %37 : vector<1x8xf32>
    %c0_14 = arith.constant 0 : index
    %c0_15 = arith.constant 0 : index
    %39 = vector.load %arg6[%c0_14, %c0_15] : memref<1x8xf32, #tpu.memory_space<vmem>>, vector<1x8xf32>
    tpu.vector_store %arg6[%c0_14, %c0_15], %38 {strides = array<i32>} : memref<1x8xf32, #tpu.memory_space<vmem>>, vector<1x8xf32>,
    %c0_16 = arith.constant 0 : index
    %c0_17 = arith.constant 0 : index
    %40 = vector.load %arg7[%c0_16, %c0_17] : memref<1x1xf32, #tpu.memory_space<vmem>>, vector<1x1xf32>
    %cst_18 = arith.constant dense<0.000000e+00> : vector<8xf32>
    %41 = vector.multi_reduction <add>, %26, %cst_18 [1] : vector<8x1xf32> to vector<8xf32>
    %42 = vector.shape_cast %41 : vector<8xf32> to vector<8x1xf32>
    %cst_19 = arith.constant dense<0.000000e+00> : vector<1xf32>
    %43 = vector.multi_reduction <add>, %42, %cst_19 [0] : vector<8x1xf32> to vector<1xf32>
    %44 = vector.shape_cast %43 : vector<1xf32> to vector<1x1xf32>
    %45 = arith.addf %40, %44 : vector<1x1xf32>
    %c0_20 = arith.constant 0 : index
    %c0_21 = arith.constant 0 : index
    %46 = vector.load %arg7[%c0_20, %c0_21] : memref<1x1xf32, #tpu.memory_space<vmem>>, vector<1x1xf32>
    tpu.vector_store %arg7[%c0_20, %c0_21], %45 {strides = array<i32>} : memref<1x1xf32, #tpu.memory_space<vmem>>, vector<1x1xf32>,
    %c0_22 = arith.constant 0 : index
    %c0_23 = arith.constant 0 : index
    %47 = vector.load %arg8[%c0_22, %c0_23] : memref<1x1xf32, #tpu.memory_space<vmem>>, vector<1x1xf32>
    %cst_24 = arith.constant dense<0.000000e+00> : vector<8xf32>
    %48 = vector.multi_reduction <add>, %18, %cst_24 [1] : vector<8x8xf32> to vector<8xf32>
    %49 = vector.shape_cast %48 : vector<8xf32> to vector<8x1xf32>
    %cst_25 = arith.constant dense<0.000000e+00> : vector<1xf32>
    %50 = vector.multi_reduction <add>, %49, %cst_25 [0] : vector<8x1xf32> to vector<1xf32>
    %51 = vector.shape_cast %50 : vector<1xf32> to vector<1x1xf32>
    %52 = arith.addf %47, %51 : vector<1x1xf32>
    %c0_26 = arith.constant 0 : index
    %c0_27 = arith.constant 0 : index
    %53 = vector.load %arg8[%c0_26, %c0_27] : memref<1x1xf32, #tpu.memory_space<vmem>>, vector<1x1xf32>
    tpu.vector_store %arg8[%c0_26, %c0_27], %52 {strides = array<i32>} : memref<1x1xf32, #tpu.memory_space<vmem>>, vector<1x1xf32>,
    %c0_28 = arith.constant 0 : index
    %c0_29 = arith.constant 0 : index
    %54 = vector.load %arg9[%c0_28, %c0_29] : memref<1x1xf32, #tpu.memory_space<vmem>>, vector<1x1xf32>
    %cst_30 = arith.constant dense<0.000000e+00> : vector<8xf32>
    %55 = vector.multi_reduction <add>, %34, %cst_30 [1] : vector<8x1xf32> to vector<8xf32>
    %56 = vector.shape_cast %55 : vector<8xf32> to vector<8x1xf32>
    %cst_31 = arith.constant dense<0.000000e+00> : vector<1xf32>
    %57 = vector.multi_reduction <add>, %56, %cst_31 [0] : vector<8x1xf32> to vector<1xf32>
    %58 = vector.shape_cast %57 : vector<1xf32> to vector<1x1xf32>
    %59 = arith.addf %54, %58 : vector<1x1xf32>
    %c0_32 = arith.constant 0 : index
    %c0_33 = arith.constant 0 : index
    %60 = vector.load %arg9[%c0_32, %c0_33] : memref<1x1xf32, #tpu.memory_space<vmem>>, vector<1x1xf32>
    tpu.vector_store %arg9[%c0_32, %c0_33], %59 {strides = array<i32>} : memref<1x1xf32, #tpu.memory_space<vmem>>, vector<1x1xf32>,
    %c0_i32_34 = arith.constant 0 : i32
    %61 = arith.cmpi eq, %arg0, %c0_i32_34 : i32
    %62 = arith.extui %61 : i1 to i32
    %c0_i32_35 = arith.constant 0 : i32
    %63 = arith.cmpi ne, %62, %c0_i32_35 : i32
    scf.if %63 {
      %c0_36 = arith.constant 0 : index
      %c0_37 = arith.constant 0 : index
      %64 = vector.load %arg6[%c0_36, %c0_37] : memref<1x8xf32, #tpu.memory_space<vmem>>, vector<1x8xf32>
      %65 = math.log %64 : vector<1x8xf32>
      %66 = vector.broadcast %4 : f32 to vector<1x8xf32>
      %67 = arith.addf %66, %65 : vector<1x8xf32>
      %cst_38 = arith.constant dense<0.000000e+00> : vector<1xf32>
      %68 = vector.multi_reduction <add>, %67, %cst_38 [1] : vector<1x8xf32> to vector<1xf32>
      %69 = vector.shape_cast %68 : vector<1xf32> to vector<1x1xf32>
      %cst_39 = arith.constant dense<0.000000e+00> : vector<1xf32>
      %70 = vector.multi_reduction <add>, %69, %cst_39 [0] : vector<1x1xf32> to vector<1xf32>
      %71 = vector.shape_cast %70 : vector<1xf32> to vector<1x1xf32>
      %c0_40 = arith.constant 0 : index
      %c0_41 = arith.constant 0 : index
      %72 = vector.load %arg7[%c0_40, %c0_41] : memref<1x1xf32, #tpu.memory_space<vmem>>, vector<1x1xf32>
      %cst_42 = arith.constant -0.699999988 : f32
      %73 = vector.broadcast %cst_42 : f32 to vector<1x1xf32>
      %74 = arith.mulf %73, %72 : vector<1x1xf32>
      %cst_43 = arith.constant 3.000000e-01 : f32
      %cst_44 = arith.constant 8.000000e+00 : f32
      %75 = arith.divf %cst_43, %cst_44 : f32
      %c0_45 = arith.constant 0 : index
      %c0_46 = arith.constant 0 : index
      %76 = vector.load %arg8[%c0_45, %c0_46] : memref<1x1xf32, #tpu.memory_space<vmem>>, vector<1x1xf32>
      %77 = vector.broadcast %75 : f32 to vector<1x1xf32>
      %78 = arith.mulf %77, %76 : vector<1x1xf32>
      %79 = arith.subf %74, %78 : vector<1x1xf32>
      %c0_47 = arith.constant 0 : index
      %c0_48 = arith.constant 0 : index
      %80 = vector.load %arg9[%c0_47, %c0_48] : memref<1x1xf32, #tpu.memory_space<vmem>>, vector<1x1xf32>
      %81 = arith.addf %80, %71 : vector<1x1xf32>
      %cst_49 = arith.constant 5.000000e-01 : f32
      %82 = vector.broadcast %cst_49 : f32 to vector<1x1xf32>
      %83 = arith.mulf %82, %81 : vector<1x1xf32>
      %84 = arith.addf %79, %83 : vector<1x1xf32>
      %cst_50 = arith.constant 8.000000e+00 : f32
      %85 = vector.broadcast %cst_50 : f32 to vector<1x1xf32>
      %86 = arith.divf %84, %85 : vector<1x1xf32>
      %c0_51 = arith.constant 0 : index
      %c0_52 = arith.constant 0 : index
      %87 = vector.load %arg4[%c0_51, %c0_52] : memref<1x1xf32, #tpu.memory_space<vmem>>, vector<1x1xf32>
      tpu.vector_store %arg4[%c0_51, %c0_52], %86 {strides = array<i32>} : memref<1x1xf32, #tpu.memory_space<vmem>>, vector<1x1xf32>,
    } else {
    }
    return
  }
  func.func @transform_0(%arg0: i32) -> (i32, i32) {
    %c0_i32 = arith.constant 0 : i32
    %c0_i32_0 = arith.constant 0 : i32
    return %arg0, %c0_i32 : i32, i32
  }
  func.func @transform_2(%arg0: i32) -> (i32, i32) {
    %c0_i32 = arith.constant 0 : i32
    %c0_i32_0 = arith.constant 0 : i32
    %c0_i32_1 = arith.constant 0 : i32
    return %c0_i32, %c0_i32_0 : i32, i32
  }
  func.func @transform_3(%arg0: i32) -> (i32, i32) {
    %c0_i32 = arith.constant 0 : i32
    %c0_i32_0 = arith.constant 0 : i32
    %c0_i32_1 = arith.constant 0 : i32
    return %c0_i32, %c0_i32_0 : i32, i32
  }
}

</mosaic_0001>

<bundles_post_ra>
// kernel: tpu_custom_call.1
= control target key start
LH: loop header
LB: loop body
LE: loop exit
PB: predicated region body
PF: predicated region fallthrough
CT: control target
= control target key end

     0   :  { %9 = vsyncpa [#allocation9], 0  ;;  %s412_s0 = inlined_call_operand.hbm [shape: f32[8,32], index: 0, kind: input, shape index: {}]   ;;  %s413_s1 = inlined_call_operand.vmem [shape: bf16[8,32], index: 1, kind: input, shape index: {}]   ;;  %s414_s2 = inlined_call_operand.<no memory space> [shape: f32[1,1], index: 2, kind: input, shape index: {}]   ;;  %s415_s3 = inlined_call_operand.hbm [shape: f32[1,1], index: 3, kind: output, shape index: {}]  }
   0x1   :  { %10 = vsyncpa [#allocation10], 0  ;;  %s338_s12 = smov [#allocation8]   ;;  %s288_s16 = scalar_lea.hbm %s412_s0, 128 }
   0x2   :  { %s17_s13 = sshll.u32 %s338_s12, 4  ;;  %p289_p0 = scmp.ne.s32.totalorder %s412_s0, %s288_s16  ;;  %s18_s13 = int_to_ptr.vmem [resolvable:$true] %s17_s13 }
   0x3   :  { %p292_p1 = scmp.lt.u32.totalorder %s288_s16, %s412_s0 }
   0x5   :  { %p294_p2 = pnand %p292_p1, %p289_p0 }
   0x7   :  { %297 = shalt.err (!%p294_p2)
}
   0x8   :  { %s298_s21 = scalar_lea.vmem %s18_s13, 128  ;;  %p303_p4 = scmp.lt.s32.totalorder %s18_s13, %s18_s13 }
   0x9   :  { %p299_p3 = scmp.ne.s32.totalorder %s18_s13, %s298_s21  ;;  %p304_p5 = scmp.lt.s32.totalorder %s298_s21, %s298_s21 }
   0xb   :  { %p305_p6 = por %p304_p5, %p303_p4 }
   0xd   :  { %p306_p7 = pnand %p305_p6, %p299_p3 }
   0xf   :  { %309 = shalt.err (!%p306_p7)
}
  0x10   :  { %20 = dma.hbm_to_vmem [thread:$0]  %s412_s0, 128, %s18_s13, [#allocation9]  }
  0x11   :  { %332 = dma.done.wait [#allocation9], 128  }
  0x12   :  { %333 = vsyncadd [#allocation9], 4294967168 }
  0x13   :  { %v48_v0 = vld [vmem:[%s413_s1] sm:$0xf] }
  0x14   :  { %49 = vst [vmem:[#allocation2] sm:$0xf] %v48_v0 }
  0x15   :  { %74 = vsyncadd [#allocation12], 64 }
  0x16   :  { %334 = dma.done.wait [#allocation12], 64 }
  0x17   :  { %335 = vsyncadd [#allocation12], 4294967232  ;;  %v90_v1 = vld [vmem:[#allocation8] sm:$0xff]  ;;  %vm92_vm0 = vcmask 261120   ;;  %v86_v2 = vstv %s414_s2  ;;  %v339_v8 = vmov 0.0   ;;  %vm340_vm1 = vmmov 0  }
  0x18   :  { %v91_v3 = vmul.f32 %v90_v1, %v90_v1  ;;  %v87_v4 = vmul.f32 1.442695, %v86_v2  ;;  %266 = vmatprep.subr.bf16.mxu0 %v339_v8  ;;  %268 = vmatprep.mubr.msk.bf16.mxu0 %vm340_vm1, %v339_v8  ;;  %vm81_vm2 = vcmask 0   ;;  %vm79_vm3 = vcmask 57344   ;;  %s341_s1 = smov [#allocation11]  }
  0x19   :  { %82 = vst.msk [vmem:[#allocation4] sm:$0x1] %vm81_vm2, %v339_v8  ;;  %84 = vst.msk [vmem:[#allocation6] sm:$0x1] %vm81_vm2, %v339_v8  ;;  %vm163_vm4 = vcmask 64512   ;;  %s242_s2 = sshll.u32 %s341_s1, 4  ;;  %s243_s2 = int_to_ptr.vmem [resolvable:$true] %s242_s2 }
  0x1a   :  { %v93_v5 = vsel %vm92_vm0, %v91_v3, 0.0  ;;  %278 = vpow2.f32 %v87_v4  ;;  %83 = vst.msk [vmem:[#allocation5] sm:$0x1] %vm81_vm2, %v339_v8  ;;  %s310_s28 = scalar_lea.vmem %s243_s2, 16  ;;  %s314_s29 = scalar_lea.vmem %s243_s2, 32 }
  0x1b   :  { %94 = vadd.xlane.f32.xlu0 %v93_v5  ;;  %v101_v7 = vld [vmem:[#allocation2] sm:$0xf]  ;;  %80 = vst.msk [vmem:[#allocation3] sm:$0x1] %vm79_vm3, %v339_v8  ;;  %p311_p8 = scmp.ne.s32.totalorder %s243_s2, %s310_s28  ;;  %p315_p9 = scmp.lt.s32.totalorder %s243_s2, %s243_s2 }
  0x1c   :  { %v107_v9 = vsel %vm92_vm0, %v101_v7, 0  ;;  %v154_v13 = vld [vmem:[#allocation2] sm:$0xf]  ;;  %p316_p10 = scmp.lt.s32.totalorder %s314_s29, %s310_s28 }
  0x1d   :  { %267 = vmatpush3.bf16.xpose.msra.mxu0 %v107_v9  ;;  %v155_v16 = vunpack.c.l.bf16 %v154_v13 }
  0x1e   :  { %p317_p11 = por %p316_p10, %p315_p9 }
  0x20   :  { %v180_v27 = vld [vmem:[#allocation4] sm:$0x1]  ;;  %p318_p12 = pnand %p317_p11, %p311_p8 }
  0x21   :  { %v191_v58 = vld [vmem:[#allocation5] sm:$0x1] }
  0x22   :  { %v170_v44 = vld [vmem:[#allocation3] sm:$0x1] }
  0x24   :  { %v279_v6 = vpop.eup %278 }
  0x25   :  { %272 = vpush %v279_v6  ;;  %v203_v6 = vld [vmem:[#allocation6] sm:$0x1] }
  0x56   :  { %s273_s0 = spop %272 }
  0x57   :  { %v382_v12 = vstv %s273_s0 }
  0xa8   :  { %v95_v10 = vpop.xlane.xlu0 %94 }
  0xa9   :  { %v96_v11 = vadd.f32 1e-12, %v95_v10 }
  0xab   :  { %280 = vrsqrt.f32 %v96_v11 }
  0xb5   :  { %v281_v14 = vpop.eup %280 }
  0xb6   :  { %v99_v15 = vmul.f32 %v281_v14, %v382_v12 }
  0xb8   :  { %v100_v17 = vmul.f32 %v99_v15, %v90_v1 }
  0xba   :  { %v102_v18 = vpack.c.bf16 %v100_v17, %v100_v17  ;;  %v156_v19 = vmul.f32 %v155_v16, %v100_v17 }
  0xbc   :  { %269 = vmatmul.mubr.msk.bf16.vlgmr.msra.gmra.mrb[0].mxu0 %vm92_vm0, %v102_v18  ;;  %v157_v20 = vsel %vm92_vm0, %v156_v19, 0.0 }
  0xbd   :  { %158 = vadd.xlane.f32.xlu1 %v157_v20 }
 0x14a   :  { %v159_v21 = vpop.xlane.xlu1 %158 }
 0x14b   :  { %v182_v22 = vrot.slane %v159_v21, 4 }
 0x14d   :  { %v183_v23 = vadd.f32 %v182_v22, %v159_v21 }
 0x14f   :  { %v184_v24 = vrot.slane %v183_v23, 2 }
 0x151   :  { %v185_v25 = vadd.f32 %v184_v24, %v183_v23 }
 0x153   :  { %v186_v26 = vrot.slane %v185_v25, 1 }
 0x155   :  { %v187_v28 = vadd.f32 %v186_v26, %v185_v25 }
 0x157   :  { %v188_v29 = vadd.f32 %v187_v28, %v180_v27 }
 0x159   :  { %190 = vst.msk [vmem:[#allocation4] sm:$0x1] %vm81_vm2, %v188_v29 }
 0x160   :  { %v224_v10 = vld [vmem:[#allocation4] sm:$0x1] }
 0x161   :  { %v225_v16 = vmul.f32 -0.7, %v224_v10 }
 0x18f   :  { %v143_v30 = vpop.f32.mrb[0].mxu0 }
 0x190   :  { %v160_v31 = vsub.f32 %v143_v30, %v382_v12  ;;  %v270_v32 = vpop.f32.mrb[1].mxu0  ;;  %v192_v33 = vsel %vm163_vm4, %v143_v30, 0.0 }
 0x191   :  { %193 = vadd.xlane.f32.xlu1 %v192_v33  ;;  %v146_v34 = vpop.f32.mrb[2].mxu0 }
 0x192   :  { %v161_v35 = vmul.f32 1.442695, %v160_v31  ;;  %v271_v36 = vpop.f32.mrb[3].mxu0 }
 0x194   :  { %282 = vpow2.f32 %v161_v35 }
 0x19e   :  { %v283_v37 = vpop.eup %282 }
 0x19f   :  { %v164_v38 = vsel %vm163_vm4, %v283_v37, 0.0 }
 0x1a0   :  { %165 = vadd.xlane.f32.xlu0 %v164_v38  ;;  %v171_v39 = vrot.slane %v164_v38, 4 }
 0x1a2   :  { %v172_v40 = vadd.f32 %v171_v39, %v164_v38 }
 0x1a4   :  { %v173_v41 = vrot.slane %v172_v40, 2 }
 0x1a6   :  { %v174_v42 = vadd.f32 %v173_v41, %v172_v40 }
 0x1a8   :  { %v175_v43 = vrot.slane %v174_v42, 1 }
 0x1aa   :  { %v176_v45 = vadd.f32 %v175_v43, %v174_v42 }
 0x1ac   :  { %v177_v46 = vadd.f32 %v176_v45, %v170_v44 }
 0x1ae   :  { %179 = vst.msk [vmem:[#allocation3] sm:$0x1] %vm79_vm3, %v177_v46 }
 0x1b5   :  { %v216_v47 = vld [vmem:[#allocation3] sm:$0x1] }
 0x1b6   :  { %284 = vlog2.f32 %v216_v47 }
 0x1c0   :  { %v285_v48 = vpop.eup %284 }
 0x1c1   :  { %v218_v49 = vmul.f32 0.6931472, %v285_v48 }
 0x1c3   :  { %v219_v50 = vadd.f32 %v218_v49, %v382_v12 }
 0x1c5   :  { %v220_v51 = vsel %vm79_vm3, %v219_v50, 0.0 }
 0x1c6   :  { %221 = vadd.xlane.f32.xlu0 %v220_v51 }
 0x21e   :  { %v194_v52 = vpop.xlane.xlu1 %193 }
 0x21f   :  { %v195_v53 = vrot.slane %v194_v52, 4 }
 0x221   :  { %v196_v54 = vadd.f32 %v195_v53, %v194_v52 }
 0x223   :  { %v197_v55 = vrot.slane %v196_v54, 2 }
 0x225   :  { %v198_v56 = vadd.f32 %v197_v55, %v196_v54 }
 0x227   :  { %v199_v57 = vrot.slane %v198_v56, 1 }
 0x229   :  { %v200_v59 = vadd.f32 %v199_v57, %v198_v56 }
 0x22b   :  { %v201_v60 = vadd.f32 %v200_v59, %v191_v58 }
 0x22d   :  { %202 = vst.msk [vmem:[#allocation5] sm:$0x1] %vm81_vm2, %v201_v60  ;;  %v166_v61 = vpop.xlane.xlu0 %165 }
 0x22e   :  { %286 = vlog2.f32 %v166_v61 }
 0x234   :  { %v226_v9 = vld [vmem:[#allocation5] sm:$0x1] }
 0x235   :  { %v227_v13 = vmul.f32 0.0375, %v226_v9 }
 0x237   :  { %v228_v18 = vsub.f32 %v225_v16, %v227_v13 }
 0x238   :  { %v287_v62 = vpop.eup %286 }
 0x239   :  { %v168_v63 = vmul.f32 0.6931472, %v287_v62 }
 0x23b   :  { %v169_v0 = vadd.f32 %v168_v63, %v382_v12 }
 0x23d   :  { %v205_v1 = vrot.slane %v169_v0, 4 }
 0x23f   :  { %v206_v2 = vadd.f32 %v205_v1, %v169_v0 }
 0x241   :  { %v207_v3 = vrot.slane %v206_v2, 2 }
 0x243   :  { %v208_v4 = vadd.f32 %v207_v3, %v206_v2 }
 0x245   :  { %v209_v5 = vrot.slane %v208_v4, 1 }
 0x247   :  { %v210_v7 = vadd.f32 %v209_v5, %v208_v4 }
 0x249   :  { %v211_v8 = vadd.f32 %v210_v7, %v203_v6 }
 0x24b   :  { %212 = vst.msk [vmem:[#allocation6] sm:$0x1] %vm81_vm2, %v211_v8 }
 0x252   :  { %v229_v11 = vld [vmem:[#allocation6] sm:$0x1] }
 0x253   :  { %v222_v14 = vpop.xlane.xlu0 %221 }
 0x254   :  { %v230_v15 = vadd.f32 %v229_v11, %v222_v14 }
 0x256   :  { %v231_v17 = vmul.f32 0.5, %v230_v15 }
 0x258   :  { %v232_v12 = vadd.f32 %v231_v17, %v228_v18 }
 0x25a   :  { %v234_v19 = vmul.f32 0.125, %v232_v12 }
 0x25c   :  { %235 = vst.msk [vmem:[#allocation11] sm:$0x1] %vm81_vm2, %v234_v19 }
 0x25d   :  { %321 = shalt.err (!%p318_p12)
}
 0x25e   :  { %s322_s5 = scalar_lea.hbm %s415_s3, 16 }
 0x25f   :  { %p323_p13 = scmp.ne.s32.totalorder %s415_s3, %s322_s5  ;;  %p326_p0 = scmp.lt.u32.totalorder %s322_s5, %s415_s3 }
 0x261   :  { %p328_p1 = pnand %p326_p0, %p323_p13 }
 0x263   :  { %331 = shalt.err (!%p328_p1)
}
 0x264   :  { %245 = dma.vmem_to_hbm [thread:$0]  %s243_s2, 16, %s415_s3, [#allocation10]  }
 0x265   :  { %336 = dma.done.wait [#allocation10], 16  }
 0x266   :  { %337 = vsyncadd [#allocation10], 4294967280 }
 0x267   :  { %249 = vsyncpa [#allocation9], 1 }
 0x268   :  { %250 = vsyncpa [#allocation10], 1 }

</bundles_post_ra>
